<compile_context>
chip_gen: v7x
topology: tpu7x:2x2x1
jax: 0.10.0
libtpu: 0.0.40
codegen_flags: <defaults>
</compile_context>

<pallas_src>
import functools

import jax
import jax.numpy as jnp
from jax.experimental import pallas as pl
from jax.experimental.pallas import tpu as pltpu

_EPS = 1e-5
_P_DROP = 0.3
_DROP_THRESHOLD = int(round(_P_DROP * (1 << 32)))  # keep iff bits >= threshold
_H1, _H2 = 128, 64
_LANE = 128  # lane-dense padded output width


def _pick_batch_tile(B):
    """Largest batch tile (multiple of 8) that exactly divides B, else B."""
    for tm in (512, 256, 128, 64, 32, 16, 8):
        if B % tm == 0:
            return tm
    return B


# ---------------- pass 1: fc1 + ReLU, accumulate BN1 sum / sumsq ------------
def _fc1_kernel(x_ref, w1_ref, b1_ref, h1_ref, sum_ref, ssq_ref):
    @pl.when(pl.program_id(0) == 0)
    def _():
        sum_ref[...] = jnp.zeros_like(sum_ref)
        ssq_ref[...] = jnp.zeros_like(ssq_ref)

    x = x_ref[...].astype(jnp.bfloat16)
    h = jnp.dot(x, w1_ref[...], preferred_element_type=jnp.float32) + b1_ref[...]
    h = jnp.maximum(h, 0.0)
    h1_ref[...] = h
    sum_ref[...] += jnp.sum(h, axis=0, keepdims=True)
    ssq_ref[...] += jnp.sum(h * h, axis=0, keepdims=True)


# ------- pass 2: BN1 affine + dropout + fc2 + ReLU, accumulate BN2 stats ----
def _mid_kernel(h1_ref, a1_ref, c1_ref, bits_ref, w2_ref, b2_ref,
                h2_ref, sum_ref, ssq_ref):
    @pl.when(pl.program_id(0) == 0)
    def _():
        sum_ref[...] = jnp.zeros_like(sum_ref)
        ssq_ref[...] = jnp.zeros_like(ssq_ref)

    # BN1 (global-batch affine, 1/(1-p) already folded in) then dropout mask.
    h = h1_ref[...] * a1_ref[...] + c1_ref[...]
    keep = bits_ref[...] >= jnp.uint32(_DROP_THRESHOLD)
    h = jnp.where(keep, h, 0.0)

    h2 = jnp.dot(h.astype(jnp.bfloat16), w2_ref[...],
                 preferred_element_type=jnp.float32) + b2_ref[...]
    h2 = jnp.maximum(h2, 0.0)
    h2_ref[...] = h2
    sum_ref[...] += jnp.sum(h2, axis=0, keepdims=True)
    ssq_ref[...] += jnp.sum(h2 * h2, axis=0, keepdims=True)


# ---------------- pass 3: BN2 affine + fc3 (lane-padded output) -------------
def _out_kernel(h2_ref, a2_ref, c2_ref, w3_ref, b3_ref, out_ref):
    z = h2_ref[...] * a2_ref[...] + c2_ref[...]
    out = jnp.dot(z.astype(jnp.bfloat16), w3_ref[...],
                  preferred_element_type=jnp.float32) + b3_ref[...]
    out_ref[...] = out


@functools.partial(jax.jit, static_argnames=("n_classes",))
def simple_classifier_forward(x, params, dropout_key, *, n_classes):
    """x: (B, n_features) f32.  Returns logits (B, n_classes) f32."""
    (w1, b1, g1, be1, w2, b2, g2, be2, w3, b3) = params
    B, F = x.shape
    tm = _pick_batch_tile(B)
    grid = (B // tm,)

    # bf16 matmul operands (f32 accumulation inside the kernels).
    w1b = w1.astype(jnp.bfloat16)
    w2b = w2.astype(jnp.bfloat16)
    # Lane-pad fc3 to a dense 128-wide output slab.
    w3p = jnp.zeros((_H2, _LANE), jnp.float32).at[:, :n_classes].set(w3)
    w3p = w3p.astype(jnp.bfloat16)
    b3p = jnp.zeros((1, _LANE), jnp.float32).at[:, :n_classes].set(b3)

    # Dropout random bits generated outside the kernel (portable, deterministic).
    bits = jax.random.bits(dropout_key, (B, _H1), dtype=jnp.uint32)

    # -------- pass 1 --------
    h1, s1, ss1 = pl.pallas_call(
        _fc1_kernel,
        grid=grid,
        in_specs=[
            pl.BlockSpec((tm, F), lambda i: (i, 0)),
            pl.BlockSpec((F, _H1), lambda i: (0, 0)),
            pl.BlockSpec((1, _H1), lambda i: (0, 0)),
        ],
        out_specs=[
            pl.BlockSpec((tm, _H1), lambda i: (i, 0)),
            pl.BlockSpec((1, _H1), lambda i: (0, 0)),
            pl.BlockSpec((1, _H1), lambda i: (0, 0)),
        ],
        out_shape=(
            jax.ShapeDtypeStruct((B, _H1), jnp.float32),
            jax.ShapeDtypeStruct((1, _H1), jnp.float32),
            jax.ShapeDtypeStruct((1, _H1), jnp.float32),
        ),
        compiler_params=pltpu.CompilerParams(
            dimension_semantics=("arbitrary",)),
    )(x, w1b, b1)

    inv_b = 1.0 / B
    drop_scale = 1.0 / (1.0 - _P_DROP)
    mu1 = s1 * inv_b
    var1 = ss1 * inv_b - mu1 * mu1
    inv1 = jax.lax.rsqrt(var1 + _EPS)
    a1 = g1 * inv1 * drop_scale                       # BN1 scale, dropout scale folded in
    c1 = (be1 - g1 * mu1 * inv1) * drop_scale         # BN1 shift, dropout scale folded in

    # -------- pass 2 --------
    h2, s2, ss2 = pl.pallas_call(
        _mid_kernel,
        grid=grid,
        in_specs=[
            pl.BlockSpec((tm, _H1), lambda i: (i, 0)),
            pl.BlockSpec((1, _H1), lambda i: (0, 0)),
            pl.BlockSpec((1, _H1), lambda i: (0, 0)),
            pl.BlockSpec((tm, _H1), lambda i: (i, 0)),
            pl.BlockSpec((_H1, _H2), lambda i: (0, 0)),
            pl.BlockSpec((1, _H2), lambda i: (0, 0)),
        ],
        out_specs=[
            pl.BlockSpec((tm, _H2), lambda i: (i, 0)),
            pl.BlockSpec((1, _H2), lambda i: (0, 0)),
            pl.BlockSpec((1, _H2), lambda i: (0, 0)),
        ],
        out_shape=(
            jax.ShapeDtypeStruct((B, _H2), jnp.float32),
            jax.ShapeDtypeStruct((1, _H2), jnp.float32),
            jax.ShapeDtypeStruct((1, _H2), jnp.float32),
        ),
        compiler_params=pltpu.CompilerParams(
            dimension_semantics=("arbitrary",)),
    )(h1, a1, c1, bits, w2b, b2)

    mu2 = s2 * inv_b
    var2 = ss2 * inv_b - mu2 * mu2
    inv2 = jax.lax.rsqrt(var2 + _EPS)
    a2 = g2 * inv2
    c2 = be2 - g2 * mu2 * inv2

    # -------- pass 3 --------
    logits_padded = pl.pallas_call(
        _out_kernel,
        grid=grid,
        in_specs=[
            pl.BlockSpec((tm, _H2), lambda i: (i, 0)),
            pl.BlockSpec((1, _H2), lambda i: (0, 0)),
            pl.BlockSpec((1, _H2), lambda i: (0, 0)),
            pl.BlockSpec((_H2, _LANE), lambda i: (0, 0)),
            pl.BlockSpec((1, _LANE), lambda i: (0, 0)),
        ],
        out_specs=pl.BlockSpec((tm, _LANE), lambda i: (i, 0)),
        out_shape=jax.ShapeDtypeStruct((B, _LANE), jnp.float32),
        compiler_params=pltpu.CompilerParams(
            dimension_semantics=("parallel",)),
    )(h2, a2, c2, w3p, b3p)

    return logits_padded[:, :n_classes]


def init_params(key, n_features, n_classes):
    """PyTorch-style Linear init (U(-1/sqrt(in), 1/sqrt(in))), BN affine gamma=1 beta=0.
    Linear weights stored transposed as (in, out); vectors kept 2D (1, H)."""
    def linear(k, fan_in, fan_out):
        k_w, k_b = jax.random.split(k)
        bound = 1.0 / jnp.sqrt(fan_in)
        w = jax.random.uniform(k_w, (fan_in, fan_out), jnp.float32, -bound, bound)
        b = jax.random.uniform(k_b, (1, fan_out), jnp.float32, -bound, bound)
        return w, b

    k1, k2, k3 = jax.random.split(key, 3)
    w1, b1 = linear(k1, n_features, _H1)
    w2, b2 = linear(k2, _H1, _H2)
    w3, b3 = linear(k3, _H2, n_classes)
    g1, be1 = jnp.ones((1, _H1), jnp.float32), jnp.zeros((1, _H1), jnp.float32)
    g2, be2 = jnp.ones((1, _H2), jnp.float32), jnp.zeros((1, _H2), jnp.float32)
    return (w1, b1, g1, be1, w2, b2, g2, be2, w3, b3)


if __name__ == "__main__":
    n_features, n_classes, batch = 32, 10, 16

    key = jax.random.PRNGKey(0)
    k_params, k_x, k_drop = jax.random.split(key, 3)
    params = init_params(k_params, n_features, n_classes)
    x = jax.random.normal(k_x, (batch, n_features), jnp.float32)

    logits = simple_classifier_forward(x, params, k_drop, n_classes=n_classes)
    logits = jax.block_until_ready(logits)

    assert logits.shape == (batch, n_classes)
    assert bool(jnp.all(jnp.isfinite(logits)))
    print("KERNEL_OK")
</pallas_src>

<mosaic_0001>
module attributes {stable_mosaic.version = 11 : i64} {
  func.func @_fc1_kernel(%arg0: i32, %arg1: memref<16x32xf32, #tpu.memory_space<vmem>>, %arg2: memref<32x128xbf16, #tpu.memory_space<vmem>>, %arg3: memref<1x128xf32, #tpu.memory_space<vmem>>, %arg4: memref<16x128xf32, #tpu.memory_space<vmem>>, %arg5: memref<1x128xf32, #tpu.memory_space<vmem>>, %arg6: memref<1x128xf32, #tpu.memory_space<vmem>>) attributes {dimension_semantics = [#tpu.dimension_semantics<arbitrary>], iteration_bounds = array<i64: 1>, scalar_prefetch = 0 : i64, scratch_operands = 0 : i64, tpu.core_type = #tpu.core_type<tc>, window_params = [{transform_indices = @transform_0, window_bounds = array<i64: 16, 32>}, {pipeline_mode = #tpu.pipeline_mode<synchronous>, transform_indices = @transform_1, window_bounds = array<i64: 32, 128>}, {pipeline_mode = #tpu.pipeline_mode<synchronous>, transform_indices = @transform_2, window_bounds = array<i64: 1, 128>}, {transform_indices = @transform_3, window_bounds = array<i64: 16, 128>}, {pipeline_mode = #tpu.pipeline_mode<synchronous>, transform_indices = @transform_4, window_bounds = array<i64: 1, 128>}, {pipeline_mode = #tpu.pipeline_mode<synchronous>, transform_indices = @transform_5, window_bounds = array<i64: 1, 128>}]} {
    %c0_i32 = arith.constant 0 : i32
    %0 = arith.cmpi eq, %arg0, %c0_i32 : i32
    %1 = arith.extui %0 : i1 to i32
    %c0_i32_0 = arith.constant 0 : i32
    %2 = arith.cmpi ne, %1, %c0_i32_0 : i32
    scf.if %2 {
      %cst_19 = arith.constant 0.000000e+00 : f32
      %24 = vector.broadcast %cst_19 : f32 to vector<1x128xf32>
      %c0_20 = arith.constant 0 : index
      %c0_21 = arith.constant 0 : index
      %25 = vector.load %arg5[%c0_20, %c0_21] : memref<1x128xf32, #tpu.memory_space<vmem>>, vector<1x128xf32>
      tpu.vector_store %arg5[%c0_20, %c0_21], %24 {strides = array<i32>} : memref<1x128xf32, #tpu.memory_space<vmem>>, vector<1x128xf32>,
      %cst_22 = arith.constant 0.000000e+00 : f32
      %26 = vector.broadcast %cst_22 : f32 to vector<1x128xf32>
      %c0_23 = arith.constant 0 : index
      %c0_24 = arith.constant 0 : index
      %27 = vector.load %arg6[%c0_23, %c0_24] : memref<1x128xf32, #tpu.memory_space<vmem>>, vector<1x128xf32>
      tpu.vector_store %arg6[%c0_23, %c0_24], %26 {strides = array<i32>} : memref<1x128xf32, #tpu.memory_space<vmem>>, vector<1x128xf32>,
    } else {
    }
    %c0 = arith.constant 0 : index
    %c0_1 = arith.constant 0 : index
    %3 = vector.load %arg1[%c0, %c0_1] : memref<16x32xf32, #tpu.memory_space<vmem>>, vector<16x32xf32>
    %4 = arith.truncf %3 : vector<16x32xf32> to vector<16x32xbf16>
    %c0_2 = arith.constant 0 : index
    %c0_3 = arith.constant 0 : index
    %5 = vector.load %arg2[%c0_2, %c0_3] : memref<32x128xbf16, #tpu.memory_space<vmem>>, vector<32x128xbf16>
    %cst = arith.constant dense<0.000000e+00> : vector<16x128xf32>
    %6 = tpu.matmul %4, %5, %cst {dimension_numbers = #tpu.dot_dimension_numbers<[1], [0], [0], [1], [0, 0, 1, 1], [], []>} : vector<16x32xbf16>, vector<32x128xbf16>, vector<16x128xf32> -> vector<16x128xf32>
    %c0_4 = arith.constant 0 : index
    %c0_5 = arith.constant 0 : index
    %7 = vector.load %arg3[%c0_4, %c0_5] : memref<1x128xf32, #tpu.memory_space<vmem>>, vector<1x128xf32>
    %8 = vector.broadcast %7 : vector<1x128xf32> to vector<16x128xf32>
    %9 = arith.addf %6, %8 : vector<16x128xf32>
    %cst_6 = arith.constant 0.000000e+00 : f32
    %10 = vector.broadcast %cst_6 : f32 to vector<16x128xf32>
    %11 = arith.maximumf %9, %10 : vector<16x128xf32>
    %c0_7 = arith.constant 0 : index
    %c0_8 = arith.constant 0 : index
    %12 = vector.load %arg4[%c0_7, %c0_8] : memref<16x128xf32, #tpu.memory_space<vmem>>, vector<16x128xf32>
    tpu.vector_store %arg4[%c0_7, %c0_8], %11 {strides = array<i32>} : memref<16x128xf32, #tpu.memory_space<vmem>>, vector<16x128xf32>,
    %c0_9 = arith.constant 0 : index
    %c0_10 = arith.constant 0 : index
    %13 = vector.load %arg5[%c0_9, %c0_10] : memref<1x128xf32, #tpu.memory_space<vmem>>, vector<1x128xf32>
    %cst_11 = arith.constant dense<0.000000e+00> : vector<128xf32>
    %14 = vector.multi_reduction <add>, %11, %cst_11 [0] : vector<16x128xf32> to vector<128xf32>
    %15 = vector.shape_cast %14 : vector<128xf32> to vector<1x128xf32>
    %16 = arith.addf %13, %15 : vector<1x128xf32>
    %c0_12 = arith.constant 0 : index
    %c0_13 = arith.constant 0 : index
    %17 = vector.load %arg5[%c0_12, %c0_13] : memref<1x128xf32, #tpu.memory_space<vmem>>, vector<1x128xf32>
    tpu.vector_store %arg5[%c0_12, %c0_13], %16 {strides = array<i32>} : memref<1x128xf32, #tpu.memory_space<vmem>>, vector<1x128xf32>,
    %c0_14 = arith.constant 0 : index
    %c0_15 = arith.constant 0 : index
    %18 = vector.load %arg6[%c0_14, %c0_15] : memref<1x128xf32, #tpu.memory_space<vmem>>, vector<1x128xf32>
    %19 = arith.mulf %11, %11 : vector<16x128xf32>
    %cst_16 = arith.constant dense<0.000000e+00> : vector<128xf32>
    %20 = vector.multi_reduction <add>, %19, %cst_16 [0] : vector<16x128xf32> to vector<128xf32>
    %21 = vector.shape_cast %20 : vector<128xf32> to vector<1x128xf32>
    %22 = arith.addf %18, %21 : vector<1x128xf32>
    %c0_17 = arith.constant 0 : index
    %c0_18 = arith.constant 0 : index
    %23 = vector.load %arg6[%c0_17, %c0_18] : memref<1x128xf32, #tpu.memory_space<vmem>>, vector<1x128xf32>
    tpu.vector_store %arg6[%c0_17, %c0_18], %22 {strides = array<i32>} : memref<1x128xf32, #tpu.memory_space<vmem>>, vector<1x128xf32>,
    return
  }
  func.func @transform_0(%arg0: i32) -> (i32, i32) {
    %c0_i32 = arith.constant 0 : i32
    %c0_i32_0 = arith.constant 0 : i32
    return %arg0, %c0_i32 : i32, i32
  }
  func.func @transform_1(%arg0: i32) -> (i32, i32) {
    %c0_i32 = arith.constant 0 : i32
    %c0_i32_0 = arith.constant 0 : i32
    %c0_i32_1 = arith.constant 0 : i32
    return %c0_i32, %c0_i32_0 : i32, i32
  }
  func.func @transform_2(%arg0: i32) -> (i32, i32) {
    %c0_i32 = arith.constant 0 : i32
    %c0_i32_0 = arith.constant 0 : i32
    %c0_i32_1 = arith.constant 0 : i32
    return %c0_i32, %c0_i32_0 : i32, i32
  }
  func.func @transform_3(%arg0: i32) -> (i32, i32) {
    %c0_i32 = arith.constant 0 : i32
    %c0_i32_0 = arith.constant 0 : i32
    return %arg0, %c0_i32 : i32, i32
  }
  func.func @transform_4(%arg0: i32) -> (i32, i32) {
    %c0_i32 = arith.constant 0 : i32
    %c0_i32_0 = arith.constant 0 : i32
    %c0_i32_1 = arith.constant 0 : i32
    return %c0_i32, %c0_i32_0 : i32, i32
  }
  func.func @transform_5(%arg0: i32) -> (i32, i32) {
    %c0_i32 = arith.constant 0 : i32
    %c0_i32_0 = arith.constant 0 : i32
    %c0_i32_1 = arith.constant 0 : i32
    return %c0_i32, %c0_i32_0 : i32, i32
  }
}

module attributes {stable_mosaic.version = 11 : i64} {
  func.func @_mid_kernel(%arg0: i32, %arg1: memref<16x128xf32, #tpu.memory_space<vmem>>, %arg2: memref<1x128xf32, #tpu.memory_space<vmem>>, %arg3: memref<1x128xf32, #tpu.memory_space<vmem>>, %arg4: memref<16x128xi32, #tpu.memory_space<vmem>>, %arg5: memref<128x64xbf16, #tpu.memory_space<vmem>>, %arg6: memref<1x64xf32, #tpu.memory_space<vmem>>, %arg7: memref<16x64xf32, #tpu.memory_space<vmem>>, %arg8: memref<1x64xf32, #tpu.memory_space<vmem>>, %arg9: memref<1x64xf32, #tpu.memory_space<vmem>>) attributes {dimension_semantics = [#tpu.dimension_semantics<arbitrary>], iteration_bounds = array<i64: 1>, scalar_prefetch = 0 : i64, scratch_operands = 0 : i64, tpu.core_type = #tpu.core_type<tc>, window_params = [{transform_indices = @transform_0, window_bounds = array<i64: 16, 128>}, {pipeline_mode = #tpu.pipeline_mode<synchronous>, transform_indices = @transform_1, window_bounds = array<i64: 1, 128>}, {pipeline_mode = #tpu.pipeline_mode<synchronous>, transform_indices = @transform_2, window_bounds = array<i64: 1, 128>}, {transform_indices = @transform_3, window_bounds = array<i64: 16, 128>}, {pipeline_mode = #tpu.pipeline_mode<synchronous>, transform_indices = @transform_4, window_bounds = array<i64: 128, 64>}, {pipeline_mode = #tpu.pipeline_mode<synchronous>, transform_indices = @transform_5, window_bounds = array<i64: 1, 64>}, {transform_indices = @transform_6, window_bounds = array<i64: 16, 64>}, {pipeline_mode = #tpu.pipeline_mode<synchronous>, transform_indices = @transform_7, window_bounds = array<i64: 1, 64>}, {pipeline_mode = #tpu.pipeline_mode<synchronous>, transform_indices = @transform_8, window_bounds = array<i64: 1, 64>}]} {
    %c0_i32 = arith.constant 0 : i32
    %0 = arith.cmpi eq, %arg0, %c0_i32 : i32
    %1 = arith.extui %0 : i1 to i32
    %c0_i32_0 = arith.constant 0 : i32
    %2 = arith.cmpi ne, %1, %c0_i32_0 : i32
    scf.if %2 {
      %cst_26 = arith.constant 0.000000e+00 : f32
      %35 = vector.broadcast %cst_26 : f32 to vector<1x64xf32>
      %c0_27 = arith.constant 0 : index
      %c0_28 = arith.constant 0 : index
      %36 = vector.load %arg8[%c0_27, %c0_28] : memref<1x64xf32, #tpu.memory_space<vmem>>, vector<1x64xf32>
      tpu.vector_store %arg8[%c0_27, %c0_28], %35 {strides = array<i32>} : memref<1x64xf32, #tpu.memory_space<vmem>>, vector<1x64xf32>,
      %cst_29 = arith.constant 0.000000e+00 : f32
      %37 = vector.broadcast %cst_29 : f32 to vector<1x64xf32>
      %c0_30 = arith.constant 0 : index
      %c0_31 = arith.constant 0 : index
      %38 = vector.load %arg9[%c0_30, %c0_31] : memref<1x64xf32, #tpu.memory_space<vmem>>, vector<1x64xf32>
      tpu.vector_store %arg9[%c0_30, %c0_31], %37 {strides = array<i32>} : memref<1x64xf32, #tpu.memory_space<vmem>>, vector<1x64xf32>,
    } else {
    }
    %c0 = arith.constant 0 : index
    %c0_1 = arith.constant 0 : index
    %3 = vector.load %arg1[%c0, %c0_1] : memref<16x128xf32, #tpu.memory_space<vmem>>, vector<16x128xf32>
    %c0_2 = arith.constant 0 : index
    %c0_3 = arith.constant 0 : index
    %4 = vector.load %arg2[%c0_2, %c0_3] : memref<1x128xf32, #tpu.memory_space<vmem>>, vector<1x128xf32>
    %5 = vector.broadcast %4 : vector<1x128xf32> to vector<16x128xf32>
    %6 = arith.mulf %3, %5 : vector<16x128xf32>
    %c0_4 = arith.constant 0 : index
    %c0_5 = arith.constant 0 : index
    %7 = vector.load %arg3[%c0_4, %c0_5] : memref<1x128xf32, #tpu.memory_space<vmem>>, vector<1x128xf32>
    %8 = vector.broadcast %7 : vector<1x128xf32> to vector<16x128xf32>
    %9 = arith.addf %6, %8 : vector<16x128xf32>
    %c0_6 = arith.constant 0 : index
    %c0_7 = arith.constant 0 : index
    %10 = vector.load %arg4[%c0_6, %c0_7] : memref<16x128xi32, #tpu.memory_space<vmem>>, vector<16x128xi32>
    %c1288490189_i32 = arith.constant 1288490189 : i32
    %11 = vector.broadcast %c1288490189_i32 : i32 to vector<16x128xi32>
    %12 = arith.cmpi uge, %10, %11 : vector<16x128xi32>
    %cst = arith.constant 0.000000e+00 : f32
    %13 = vector.broadcast %cst : f32 to vector<16x128xf32>
    %14 = arith.select %12, %9, %13 : vector<16x128xi1>, vector<16x128xf32>
    %15 = arith.truncf %14 : vector<16x128xf32> to vector<16x128xbf16>
    %c0_8 = arith.constant 0 : index
    %c0_9 = arith.constant 0 : index
    %16 = vector.load %arg5[%c0_8, %c0_9] : memref<128x64xbf16, #tpu.memory_space<vmem>>, vector<128x64xbf16>
    %cst_10 = arith.constant dense<0.000000e+00> : vector<16x64xf32>
    %17 = tpu.matmul %15, %16, %cst_10 {dimension_numbers = #tpu.dot_dimension_numbers<[1], [0], [0], [1], [0, 0, 1, 1], [], []>} : vector<16x128xbf16>, vector<128x64xbf16>, vector<16x64xf32> -> vector<16x64xf32>
    %c0_11 = arith.constant 0 : index
    %c0_12 = arith.constant 0 : index
    %18 = vector.load %arg6[%c0_11, %c0_12] : memref<1x64xf32, #tpu.memory_space<vmem>>, vector<1x64xf32>
    %19 = vector.broadcast %18 : vector<1x64xf32> to vector<16x64xf32>
    %20 = arith.addf %17, %19 : vector<16x64xf32>
    %cst_13 = arith.constant 0.000000e+00 : f32
    %21 = vector.broadcast %cst_13 : f32 to vector<16x64xf32>
    %22 = arith.maximumf %20, %21 : vector<16x64xf32>
    %c0_14 = arith.constant 0 : index
    %c0_15 = arith.constant 0 : index
    %23 = vector.load %arg7[%c0_14, %c0_15] : memref<16x64xf32, #tpu.memory_space<vmem>>, vector<16x64xf32>
    tpu.vector_store %arg7[%c0_14, %c0_15], %22 {strides = array<i32>} : memref<16x64xf32, #tpu.memory_space<vmem>>, vector<16x64xf32>,
    %c0_16 = arith.constant 0 : index
    %c0_17 = arith.constant 0 : index
    %24 = vector.load %arg8[%c0_16, %c0_17] : memref<1x64xf32, #tpu.memory_space<vmem>>, vector<1x64xf32>
    %cst_18 = arith.constant dense<0.000000e+00> : vector<64xf32>
    %25 = vector.multi_reduction <add>, %22, %cst_18 [0] : vector<16x64xf32> to vector<64xf32>
    %26 = vector.shape_cast %25 : vector<64xf32> to vector<1x64xf32>
    %27 = arith.addf %24, %26 : vector<1x64xf32>
    %c0_19 = arith.constant 0 : index
    %c0_20 = arith.constant 0 : index
    %28 = vector.load %arg8[%c0_19, %c0_20] : memref<1x64xf32, #tpu.memory_space<vmem>>, vector<1x64xf32>
    tpu.vector_store %arg8[%c0_19, %c0_20], %27 {strides = array<i32>} : memref<1x64xf32, #tpu.memory_space<vmem>>, vector<1x64xf32>,
    %c0_21 = arith.constant 0 : index
    %c0_22 = arith.constant 0 : index
    %29 = vector.load %arg9[%c0_21, %c0_22] : memref<1x64xf32, #tpu.memory_space<vmem>>, vector<1x64xf32>
    %30 = arith.mulf %22, %22 : vector<16x64xf32>
    %cst_23 = arith.constant dense<0.000000e+00> : vector<64xf32>
    %31 = vector.multi_reduction <add>, %30, %cst_23 [0] : vector<16x64xf32> to vector<64xf32>
    %32 = vector.shape_cast %31 : vector<64xf32> to vector<1x64xf32>
    %33 = arith.addf %29, %32 : vector<1x64xf32>
    %c0_24 = arith.constant 0 : index
    %c0_25 = arith.constant 0 : index
    %34 = vector.load %arg9[%c0_24, %c0_25] : memref<1x64xf32, #tpu.memory_space<vmem>>, vector<1x64xf32>
    tpu.vector_store %arg9[%c0_24, %c0_25], %33 {strides = array<i32>} : memref<1x64xf32, #tpu.memory_space<vmem>>, vector<1x64xf32>,
    return
  }
  func.func @transform_0(%arg0: i32) -> (i32, i32) {
    %c0_i32 = arith.constant 0 : i32
    %c0_i32_0 = arith.constant 0 : i32
    return %arg0, %c0_i32 : i32, i32
  }
  func.func @transform_1(%arg0: i32) -> (i32, i32) {
    %c0_i32 = arith.constant 0 : i32
    %c0_i32_0 = arith.constant 0 : i32
    %c0_i32_1 = arith.constant 0 : i32
    return %c0_i32, %c0_i32_0 : i32, i32
  }
  func.func @transform_2(%arg0: i32) -> (i32, i32) {
    %c0_i32 = arith.constant 0 : i32
    %c0_i32_0 = arith.constant 0 : i32
    %c0_i32_1 = arith.constant 0 : i32
    return %c0_i32, %c0_i32_0 : i32, i32
  }
  func.func @transform_3(%arg0: i32) -> (i32, i32) {
    %c0_i32 = arith.constant 0 : i32
    %c0_i32_0 = arith.constant 0 : i32
    return %arg0, %c0_i32 : i32, i32
  }
  func.func @transform_4(%arg0: i32) -> (i32, i32) {
    %c0_i32 = arith.constant 0 : i32
    %c0_i32_0 = arith.constant 0 : i32
    %c0_i32_1 = arith.constant 0 : i32
    return %c0_i32, %c0_i32_0 : i32, i32
  }
  func.func @transform_5(%arg0: i32) -> (i32, i32) {
    %c0_i32 = arith.constant 0 : i32
    %c0_i32_0 = arith.constant 0 : i32
    %c0_i32_1 = arith.constant 0 : i32
    return %c0_i32, %c0_i32_0 : i32, i32
  }
  func.func @transform_6(%arg0: i32) -> (i32, i32) {
    %c0_i32 = arith.constant 0 : i32
    %c0_i32_0 = arith.constant 0 : i32
    return %arg0, %c0_i32 : i32, i32
  }
  func.func @transform_7(%arg0: i32) -> (i32, i32) {
    %c0_i32 = arith.constant 0 : i32
    %c0_i32_0 = arith.constant 0 : i32
    %c0_i32_1 = arith.constant 0 : i32
    return %c0_i32, %c0_i32_0 : i32, i32
  }
  func.func @transform_8(%arg0: i32) -> (i32, i32) {
    %c0_i32 = arith.constant 0 : i32
    %c0_i32_0 = arith.constant 0 : i32
    %c0_i32_1 = arith.constant 0 : i32
    return %c0_i32, %c0_i32_0 : i32, i32
  }
}

module attributes {stable_mosaic.version = 11 : i64} {
  func.func @_out_kernel(%arg0: i32, %arg1: memref<16x64xf32, #tpu.memory_space<vmem>>, %arg2: memref<1x64xf32, #tpu.memory_space<vmem>>, %arg3: memref<1x64xf32, #tpu.memory_space<vmem>>, %arg4: memref<64x128xbf16, #tpu.memory_space<vmem>>, %arg5: memref<1x128xf32, #tpu.memory_space<vmem>>, %arg6: memref<16x128xf32, #tpu.memory_space<vmem>>) attributes {dimension_semantics = [#tpu.dimension_semantics<parallel>], iteration_bounds = array<i64: 1>, scalar_prefetch = 0 : i64, scratch_operands = 0 : i64, tpu.core_type = #tpu.core_type<tc>, window_params = [{transform_indices = @transform_0, window_bounds = array<i64: 16, 64>}, {pipeline_mode = #tpu.pipeline_mode<synchronous>, transform_indices = @transform_1, window_bounds = array<i64: 1, 64>}, {pipeline_mode = #tpu.pipeline_mode<synchronous>, transform_indices = @transform_2, window_bounds = array<i64: 1, 64>}, {pipeline_mode = #tpu.pipeline_mode<synchronous>, transform_indices = @transform_3, window_bounds = array<i64: 64, 128>}, {pipeline_mode = #tpu.pipeline_mode<synchronous>, transform_indices = @transform_4, window_bounds = array<i64: 1, 128>}, {transform_indices = @transform_5, window_bounds = array<i64: 16, 128>}]} {
    %c0 = arith.constant 0 : index
    %c0_0 = arith.constant 0 : index
    %0 = vector.load %arg1[%c0, %c0_0] : memref<16x64xf32, #tpu.memory_space<vmem>>, vector<16x64xf32>
    %c0_1 = arith.constant 0 : index
    %c0_2 = arith.constant 0 : index
    %1 = vector.load %arg2[%c0_1, %c0_2] : memref<1x64xf32, #tpu.memory_space<vmem>>, vector<1x64xf32>
    %2 = vector.broadcast %1 : vector<1x64xf32> to vector<16x64xf32>
    %3 = arith.mulf %0, %2 : vector<16x64xf32>
    %c0_3 = arith.constant 0 : index
    %c0_4 = arith.constant 0 : index
    %4 = vector.load %arg3[%c0_3, %c0_4] : memref<1x64xf32, #tpu.memory_space<vmem>>, vector<1x64xf32>
    %5 = vector.broadcast %4 : vector<1x64xf32> to vector<16x64xf32>
    %6 = arith.addf %3, %5 : vector<16x64xf32>
    %7 = arith.truncf %6 : vector<16x64xf32> to vector<16x64xbf16>
    %c0_5 = arith.constant 0 : index
    %c0_6 = arith.constant 0 : index
    %8 = vector.load %arg4[%c0_5, %c0_6] : memref<64x128xbf16, #tpu.memory_space<vmem>>, vector<64x128xbf16>
    %cst = arith.constant dense<0.000000e+00> : vector<16x128xf32>
    %9 = tpu.matmul %7, %8, %cst {dimension_numbers = #tpu.dot_dimension_numbers<[1], [0], [0], [1], [0, 0, 1, 1], [], []>} : vector<16x64xbf16>, vector<64x128xbf16>, vector<16x128xf32> -> vector<16x128xf32>
    %c0_7 = arith.constant 0 : index
    %c0_8 = arith.constant 0 : index
    %10 = vector.load %arg5[%c0_7, %c0_8] : memref<1x128xf32, #tpu.memory_space<vmem>>, vector<1x128xf32>
    %11 = vector.broadcast %10 : vector<1x128xf32> to vector<16x128xf32>
    %12 = arith.addf %9, %11 : vector<16x128xf32>
    %c0_9 = arith.constant 0 : index
    %c0_10 = arith.constant 0 : index
    %13 = vector.load %arg6[%c0_9, %c0_10] : memref<16x128xf32, #tpu.memory_space<vmem>>, vector<16x128xf32>
    tpu.vector_store %arg6[%c0_9, %c0_10], %12 {strides = array<i32>} : memref<16x128xf32, #tpu.memory_space<vmem>>, vector<16x128xf32>,
    return
  }
  func.func @transform_0(%arg0: i32) -> (i32, i32) {
    %c0_i32 = arith.constant 0 : i32
    %c0_i32_0 = arith.constant 0 : i32
    return %arg0, %c0_i32 : i32, i32
  }
  func.func @transform_1(%arg0: i32) -> (i32, i32) {
    %c0_i32 = arith.constant 0 : i32
    %c0_i32_0 = arith.constant 0 : i32
    %c0_i32_1 = arith.constant 0 : i32
    return %c0_i32, %c0_i32_0 : i32, i32
  }
  func.func @transform_2(%arg0: i32) -> (i32, i32) {
    %c0_i32 = arith.constant 0 : i32
    %c0_i32_0 = arith.constant 0 : i32
    %c0_i32_1 = arith.constant 0 : i32
    return %c0_i32, %c0_i32_0 : i32, i32
  }
  func.func @transform_3(%arg0: i32) -> (i32, i32) {
    %c0_i32 = arith.constant 0 : i32
    %c0_i32_0 = arith.constant 0 : i32
    %c0_i32_1 = arith.constant 0 : i32
    return %c0_i32, %c0_i32_0 : i32, i32
  }
  func.func @transform_4(%arg0: i32) -> (i32, i32) {
    %c0_i32 = arith.constant 0 : i32
    %c0_i32_0 = arith.constant 0 : i32
    %c0_i32_1 = arith.constant 0 : i32
    return %c0_i32, %c0_i32_0 : i32, i32
  }
  func.func @transform_5(%arg0: i32) -> (i32, i32) {
    %c0_i32 = arith.constant 0 : i32
    %c0_i32_0 = arith.constant 0 : i32
    return %arg0, %c0_i32 : i32, i32
  }
}

</mosaic_0001>

<bundles_post_ra>
// kernel: simple_classifier_forward.4
= control target key start
LH: loop header
LB: loop body
LE: loop exit
PB: predicated region body
PF: predicated region fallthrough
CT: control target
= control target key end

     0   :  { %v270_v0 = vmov 0.0   ;;  %vm271_vm0 = vmmov 0   ;;  %vm31_vm4 = vcmask 516096   ;;  %vm175_vm5 = vcmask 523264   ;;  %s390_s4 = inlined_call_operand.vmem [shape: bf16[128,64], index: 4, kind: input, shape index: {}]   ;;  %s391_s0 = inlined_call_operand.vmem [shape: f32[16,128], index: 0, kind: input, shape index: {}]   ;;  %s392_s1 = inlined_call_operand.vmem [shape: f32[1,128], index: 1, kind: input, shape index: {}]   ;;  %s393_s2 = inlined_call_operand.vmem [shape: f32[1,128], index: 2, kind: input, shape index: {}]   ;;  %s394_s3 = inlined_call_operand.vmem [shape: u32[16,128], index: 3, kind: input, shape index: {}]   ;;  %s395_s7 = inlined_call_operand.vmem [shape: f32[1,64], index: 7, kind: output, shape index: {1}]   ;;  %s396_s8 = inlined_call_operand.vmem [shape: f32[1,64], index: 8, kind: output, shape index: {2}]   ;;  %s397_s5 = inlined_call_operand.vmem [shape: f32[1,64], index: 5, kind: input, shape index: {}]   ;;  %s398_s6 = inlined_call_operand.vmem [shape: f32[16,64], index: 6, kind: output, shape index: {0}]  }
   0x1   :  { %240 = vmatprep.subr.bf16.mxu0 %v270_v0  ;;  %v262_v1 = vld [vmem:[%s390_s4] sm:$0xff]   ;;  %256 = vmatprep.mubr.msk.bf16.mxu0 %vm271_vm0, %v270_v0  ;;  %v263_v2 = vld [vmem:[%s390_s4 + $0x8] sm:$0xff]   ;;  %v264_v3 = vld [vmem:[%s390_s4 + $0x10] sm:$0xff]   ;;  %32 = vst.msk [vmem:[%s395_s7] sm:$0x1] %vm31_vm4, %v270_v0 }
   0x2   :  { %241 = vmatpush3.bf16.msra.mxu0 %v262_v1  ;;  %v265_v4 = vld [vmem:[%s390_s4 + $0x18] sm:$0xff]   ;;  %v266_v5 = vld [vmem:[%s390_s4 + $0x20] sm:$0xff]   ;;  %v267_v6 = vld [vmem:[%s390_s4 + $0x28] sm:$0xff]   ;;  %33 = vst.msk [vmem:[%s396_s8] sm:$0x1] %vm31_vm4, %v270_v0 }
   0x3   :  { %242 = vmatprep.subr.bf16.mxu0 %v270_v0  ;;  %v34_v7 = vld [vmem:[%s391_s0] sm:$0xff]  ;;  %v35_v8 = vld [vmem:[%s391_s0 + $0x8] sm:$0xff]  ;;  %v268_v12 = vld [vmem:[%s390_s4 + $0x30] sm:$0xff]  }
   0x4   :  { %v217_v9 = vld [vmem:[%s392_s1] ss:$0 sm:$0xff]  ;;  %v55_v15 = vld [vmem:[%s394_s3 + $0x8] sm:$0xff]  ;;  %v269_v18 = vld [vmem:[%s390_s4 + $0x38] sm:$0xff]  }
   0x5   :  { %v43_v10 = vmul.f32 %v217_v9, %v34_v7  ;;  %v44_v11 = vmul.f32 %v217_v9, %v35_v8  ;;  %v218_v13 = vld [vmem:[%s393_s2] ss:$0 sm:$0xff]  ;;  %vm57_vm2 = vcmp.ge.u32.totalorder %v55_v15, 1288490189 }
   0x6   :  { %243 = vmatpush3.bf16.msra.mxu0 %v263_v2  ;;  %v54_v14 = vld [vmem:[%s394_s3] sm:$0xff] }
   0x7   :  { %244 = vmatprep.subr.bf16.mxu0 %v270_v0  ;;  %v52_v16 = vadd.f32 %v218_v13, %v43_v10  ;;  %v53_v17 = vadd.f32 %v218_v13, %v44_v11  ;;  %vm56_vm1 = vcmp.ge.u32.totalorder %v54_v14, 1288490189  ;;  %v219_v20 = vld [vmem:[%s397_s5] ss:$0 sm:$0xff] }
   0x8   :  { %vm228_vm3 = vmpackc.low %vm57_vm2, %vm56_vm1  ;;  %v178_v46 = vld [vmem:[%s395_s7] sm:$0x1] }
   0x9   :  { %v229_v19 = vpack.c.bf16 %v53_v17, %v52_v16  ;;  %v191_v49 = vld [vmem:[%s396_s8] sm:$0x1] }
   0xa   :  { %245 = vmatpush3.bf16.msra.mxu0 %v264_v3 }
   0xb   :  { %246 = vmatprep.subr.bf16.mxu0 %v270_v0 }
   0xe   :  { %247 = vmatpush3.bf16.msra.mxu0 %v265_v4 }
   0xf   :  { %248 = vmatprep.subr.bf16.mxu0 %v270_v0 }
  0x12   :  { %249 = vmatpush3.bf16.msra.mxu0 %v266_v5 }
  0x13   :  { %250 = vmatprep.subr.bf16.mxu0 %v270_v0 }
  0x16   :  { %251 = vmatpush3.bf16.msra.mxu0 %v267_v6 }
  0x17   :  { %252 = vmatprep.subr.bf16.mxu0 %v270_v0 }
  0x1a   :  { %253 = vmatpush3.bf16.msra.mxu0 %v268_v12 }
  0x1b   :  { %254 = vmatprep.subr.bf16.mxu0 %v270_v0 }
  0x1e   :  { %255 = vmatpush3.bf16.msra.mxu0 %v269_v18 }
  0x21   :  { %257 = vmatmul.mubr.msk.bf16.vlgmr.msra.gmra.mrb[0].mxu0 %vm228_vm3, %v229_v19 }
  0xf4   :  { %v166_v21 = vpop.f32.mrb[0].mxu0 }
  0xf5   :  { %v167_v22 = vadd.f32 %v219_v20, %v166_v21  ;;  %v258_v23 = vpop.f32.mrb[1].mxu0 }
  0xf6   :  { %v169_v24 = vpop.f32.mrb[2].mxu0 }
  0xf7   :  { %v173_v25 = vmax.f32 %v167_v22, 0.0  ;;  %v170_v26 = vadd.f32 %v219_v20, %v169_v24  ;;  %v259_v27 = vpop.f32.mrb[3].mxu0 }
  0xf9   :  { %176 = vst.msk [vmem:[%s398_s6] sm:$0xff] %vm175_vm5, %v173_v25  ;;  %v192_v28 = vmul.f32 %v173_v25, %v173_v25  ;;  %v174_v29 = vmax.f32 %v170_v26, 0.0  ;;  %v179_v30 = vsel %vm175_vm5, %v173_v25, 0.0 }
  0xfb   :  { %177 = vst.msk [vmem:[%s398_s6 + $0x8] sm:$0xff] %vm175_vm5, %v174_v29  ;;  %v180_v31 = vsel %vm175_vm5, %v174_v29, 0.0  ;;  %v193_v32 = vmul.f32 %v174_v29, %v174_v29  ;;  %v194_v34 = vsel %vm175_vm5, %v192_v28, 0.0 }
  0xfc   :  { %v181_v33 = vadd.f32 %v180_v31, %v179_v30 }
  0xfd   :  { %v195_v35 = vsel %vm175_vm5, %v193_v32, 0.0 }
  0xfe   :  { %v182_v36 = vrot.slane %v181_v33, 4  ;;  %v196_v37 = vadd.f32 %v195_v35, %v194_v34 }
 0x100   :  { %v183_v38 = vadd.f32 %v182_v36, %v181_v33  ;;  %v197_v39 = vrot.slane %v196_v37, 4 }
 0x102   :  { %v184_v40 = vrot.slane %v183_v38, 2  ;;  %v198_v41 = vadd.f32 %v197_v39, %v196_v37 }
 0x104   :  { %v185_v42 = vadd.f32 %v184_v40, %v183_v38  ;;  %v199_v43 = vrot.slane %v198_v41, 2 }
 0x106   :  { %v186_v44 = vrot.slane %v185_v42, 1  ;;  %v200_v45 = vadd.f32 %v199_v43, %v198_v41 }
 0x108   :  { %v187_v47 = vadd.f32 %v186_v44, %v185_v42  ;;  %v201_v48 = vrot.slane %v200_v45, 1 }
 0x10a   :  { %v188_v50 = vadd.f32 %v187_v47, %v178_v46  ;;  %v202_v51 = vadd.f32 %v201_v48, %v200_v45 }
 0x10c   :  { %190 = vst.msk [vmem:[%s395_s7] sm:$0x1] %vm31_vm4, %v188_v50  ;;  %v203_v52 = vadd.f32 %v202_v51, %v191_v49 }
 0x10e   :  { %204 = vst.msk [vmem:[%s396_s8] sm:$0x1] %vm31_vm4, %v203_v52 }

// kernel: simple_classifier_forward.5
= control target key start
LH: loop header
LB: loop body
LE: loop exit
PB: predicated region body
PF: predicated region fallthrough
CT: control target
= control target key end

     0   :  { %v203_v1 = vmov 0.0   ;;  %vm204_vm0 = vmmov 0   ;;  %s277_s0 = inlined_call_operand.vmem [shape: f32[16,64], index: 0, kind: input, shape index: {}]   ;;  %s278_s1 = inlined_call_operand.vmem [shape: f32[1,64], index: 1, kind: input, shape index: {}]   ;;  %s279_s2 = inlined_call_operand.vmem [shape: f32[1,64], index: 2, kind: input, shape index: {}]   ;;  %s280_s3 = inlined_call_operand.vmem [shape: bf16[64,128], index: 3, kind: input, shape index: {}]   ;;  %s281_s4 = inlined_call_operand.vmem [shape: f32[1,128], index: 4, kind: input, shape index: {}]   ;;  %s282_s5 = inlined_call_operand.hbm [shape: f32[16,128], index: 5, kind: output, shape index: {}]  }
   0x1   :  { %v175_v0 = vld [vmem:[%s280_s3] sm:$0xff]   ;;  %158 = vmatprep.subr.bf16.mxu0 %v203_v1  ;;  %v176_v2 = vld [vmem:[%s280_s3 + $0x8] sm:$0xff]   ;;  %166 = vmatprep.mubr.msk.bf16.mxu0 %vm204_vm0, %v203_v1 }
   0x2   :  { %159 = vmatpush3.bf16.msra.mxu0 %v175_v0  ;;  %v22_v3 = vld [vmem:[%s277_s0] sm:$0xff]  ;;  %v23_v4 = vld [vmem:[%s277_s0 + $0x8] sm:$0xff] }
   0x3   :  { %160 = vmatprep.subr.bf16.mxu0 %v203_v1  ;;  %v145_v5 = vld [vmem:[%s278_s1] ss:$0 sm:$0xff] }
   0x4   :  { %v31_v6 = vmul.f32 %v145_v5, %v22_v3  ;;  %v32_v7 = vmul.f32 %v145_v5, %v23_v4 }
   0x5   :  { %10 = vsyncpa [#allocation3], 0  ;;  %v177_v8 = vld [vmem:[%s280_s3 + $0x10] sm:$0xff]   ;;  %v146_v9 = vld [vmem:[%s279_s2] ss:$0 sm:$0xff]  ;;  %vm82_vm1 = vcmask 523264  }
   0x6   :  { %161 = vmatpush3.bf16.msra.mxu0 %v176_v2  ;;  %v40_v10 = vadd.f32 %v146_v9, %v31_v6  ;;  %v41_v11 = vadd.f32 %v146_v9, %v32_v7  ;;  %v178_v12 = vld [vmem:[%s280_s3 + $0x18] sm:$0xff]   ;;  %v147_v14 = vld [vmem:[%s281_s4] ss:$0 sm:$0xff]  ;;  %s205_s9 = smov [#allocation2]  }
   0x7   :  { %162 = vmatprep.subr.bf16.mxu0 %v203_v1  ;;  %s134_s10 = sshll.u32 %s205_s9, 4  ;;  %s135_s10 = int_to_ptr.vmem [resolvable:$true] %s134_s10 }
   0x8   :  { %v42_v13 = vpack.c.bf16 %v41_v11, %v40_v10  ;;  %s179_s2 = scalar_lea.vmem %s135_s10, 256  ;;  %p184_p1 = scmp.lt.s32.totalorder %s135_s10, %s135_s10 }
   0x9   :  { %p180_p0 = scmp.ne.s32.totalorder %s135_s10, %s179_s2  ;;  %p185_p2 = scmp.lt.s32.totalorder %s179_s2, %s179_s2 }
   0xa   :  { %163 = vmatpush3.bf16.msra.mxu0 %v177_v8 }
   0xb   :  { %164 = vmatprep.subr.bf16.mxu0 %v203_v1  ;;  %p186_p3 = por %p185_p2, %p184_p1 }
   0xd   :  { %p187_p4 = pnand %p186_p3, %p180_p0 }
   0xe   :  { %165 = vmatpush3.bf16.msra.mxu0 %v178_v12 }
  0x11   :  { %167 = vmatmul.mubr.msk.bf16.vlgmr.msra.gmra.mrb[0].mxu0 %vm82_vm1, %v42_v13 }
  0xe4   :  { %v120_v15 = vpop.f32.mrb[0].mxu0 }
  0xe5   :  { %v121_v16 = vadd.f32 %v147_v14, %v120_v15  ;;  %v168_v17 = vpop.f32.mrb[1].mxu0 }
  0xe6   :  { %v123_v18 = vpop.f32.mrb[2].mxu0 }
  0xe7   :  { %127 = vst [vmem:[#allocation2] sm:$0xff] %v121_v16  ;;  %v124_v19 = vadd.f32 %v147_v14, %v123_v18  ;;  %v169_v20 = vpop.f32.mrb[3].mxu0 }
  0xe9   :  { %128 = vst [vmem:[#allocation2 + $0x8] sm:$0xff] %v124_v19 }
  0xea   :  { %190 = shalt.err (!%p187_p4)
}
  0xeb   :  { %s191_s11 = scalar_lea.hbm %s282_s5, 256 }
  0xec   :  { %p192_p5 = scmp.ne.s32.totalorder %s282_s5, %s191_s11  ;;  %p195_p6 = scmp.lt.u32.totalorder %s191_s11, %s282_s5 }
  0xee   :  { %p197_p7 = pnand %p195_p6, %p192_p5 }
  0xf0   :  { %200 = shalt.err (!%p197_p7)
}
  0xf1   :  { %s206_s16 = smov 128   ;;  %s207_s17 = smov 8  }
  0xf2   :  { %140 = dma.vmem_to_hbm [thread:$0]  %s135_s10, 256, %s282_s5, [#allocation3], %s206_s16, %s206_s16, %s207_s17  }
  0xf3   :  { %201 = dma.done.wait [#allocation3], 256  }
  0xf4   :  { %202 = vsyncadd [#allocation3], 4294967040 }
  0xf5   :  { %144 = vsyncpa [#allocation3], 1 }

// kernel: simple_classifier_forward.3
= control target key start
LH: loop header
LB: loop body
LE: loop exit
PB: predicated region body
PF: predicated region fallthrough
CT: control target
= control target key end

     0   :  { %v152_v0 = vmov 0.0   ;;  %vm153_vm0 = vmmov 0   ;;  %vm50_vm1 = vcmask 261120   ;;  %s223_s4 = inlined_call_operand.vmem [shape: f32[1,128], index: 4, kind: output, shape index: {1}]   ;;  %s224_s5 = inlined_call_operand.vmem [shape: f32[1,128], index: 5, kind: output, shape index: {2}]   ;;  %s225_s1 = inlined_call_operand.vmem [shape: bf16[32,128], index: 1, kind: input, shape index: {}]   ;;  %s226_s0 = inlined_call_operand.vmem [shape: f32[16,32], index: 0, kind: input, shape index: {}]   ;;  %s227_s2 = inlined_call_operand.vmem [shape: f32[1,128], index: 2, kind: input, shape index: {}]   ;;  %s228_s3 = inlined_call_operand.vmem [shape: f32[16,128], index: 3, kind: output, shape index: {0}]  }
   0x1   :  { %22 = vst [vmem:[%s223_s4] sm:$0x1] %v152_v0  ;;  %23 = vst [vmem:[%s224_s5] sm:$0x1] %v152_v0  ;;  %140 = vmatprep.subr.bf16.mxu0 %v152_v0  ;;  %v150_v1 = vld [vmem:[%s225_s1] sm:$0xff]   ;;  %144 = vmatprep.mubr.msk.bf16.mxu0 %vm153_vm0, %v152_v0  ;;  %v151_v2 = vld [vmem:[%s225_s1 + $0x8] sm:$0xff]  }
   0x2   :  { %141 = vmatpush3.bf16.msra.mxu0 %v150_v1  ;;  %v24_v3 = vld [vmem:[%s226_s0] sm:$0xff]  ;;  %v25_v4 = vld [vmem:[%s226_s0 + $0x8] sm:$0xff] }
   0x3   :  { %142 = vmatprep.subr.bf16.mxu0 %v152_v0  ;;  %v26_v5 = vpack.c.bf16 %v25_v4, %v24_v3  ;;  %v133_v6 = vld [vmem:[%s227_s2] ss:$0 sm:$0xff] }
   0x6   :  { %143 = vmatpush3.bf16.msra.mxu0 %v151_v2 }
   0x8   :  { %v99_v28 = vld [vmem:[%s223_s4] sm:$0x1] }
   0x9   :  { %145 = vmatmul.mubr.msk.bf16.vlgmr.msra.gmra.mrb[0].mxu0 %vm50_vm1, %v26_v5  ;;  %v109_v31 = vld [vmem:[%s224_s5] sm:$0x1] }
  0xdc   :  { %v88_v7 = vpop.f32.mrb[0].mxu0 }
  0xdd   :  { %v89_v8 = vadd.f32 %v133_v6, %v88_v7  ;;  %v146_v9 = vpop.f32.mrb[1].mxu0 }
  0xde   :  { %v91_v10 = vpop.f32.mrb[2].mxu0 }
  0xdf   :  { %v95_v11 = vmax.f32 %v89_v8, 0.0  ;;  %v92_v12 = vadd.f32 %v133_v6, %v91_v10  ;;  %v147_v13 = vpop.f32.mrb[3].mxu0 }
  0xe1   :  { %97 = vst [vmem:[%s228_s3] sm:$0xff] %v95_v11  ;;  %v96_v14 = vmax.f32 %v92_v12, 0.0  ;;  %v110_v15 = vmul.f32 %v95_v11, %v95_v11 }
  0xe3   :  { %98 = vst [vmem:[%s228_s3 + $0x8] sm:$0xff] %v96_v14  ;;  %v100_v16 = vadd.f32 %v96_v14, %v95_v11  ;;  %v111_v17 = vmul.f32 %v96_v14, %v96_v14 }
  0xe5   :  { %v101_v18 = vrot.slane %v100_v16, 4  ;;  %v112_v19 = vadd.f32 %v111_v17, %v110_v15 }
  0xe7   :  { %v102_v20 = vadd.f32 %v101_v18, %v100_v16  ;;  %v113_v21 = vrot.slane %v112_v19, 4 }
  0xe9   :  { %v103_v22 = vrot.slane %v102_v20, 2  ;;  %v114_v23 = vadd.f32 %v113_v21, %v112_v19 }
  0xeb   :  { %v104_v24 = vadd.f32 %v103_v22, %v102_v20  ;;  %v115_v25 = vrot.slane %v114_v23, 2 }
  0xed   :  { %v105_v26 = vrot.slane %v104_v24, 1  ;;  %v116_v27 = vadd.f32 %v115_v25, %v114_v23 }
  0xef   :  { %v106_v29 = vadd.f32 %v105_v26, %v104_v24  ;;  %v117_v30 = vrot.slane %v116_v27, 1 }
  0xf1   :  { %v107_v32 = vadd.f32 %v106_v29, %v99_v28  ;;  %v118_v33 = vadd.f32 %v117_v30, %v116_v27 }
  0xf3   :  { %108 = vst [vmem:[%s223_s4] sm:$0x1] %v107_v32  ;;  %v119_v34 = vadd.f32 %v118_v33, %v109_v31 }
  0xf5   :  { %120 = vst [vmem:[%s224_s5] sm:$0x1] %v119_v34 }

</bundles_post_ra>
